<compile_context>
chip_gen: v7x
topology: tpu7x:2x2x1
jax: 0.10.0
libtpu: 0.0.40
codegen_flags: <defaults>
</compile_context>

<pallas_src>
import functools

import jax
import jax.numpy as jnp
from jax.experimental import pallas as pl
from jax.experimental.pallas import tpu as pltpu


def _ls_ce_kernel(x_ref, xt_ref, loss_ref,          # input / output blocks
                  m_ref, s_ref, sx_ref,              # (TN,1) f32 VMEM carries
                  *, smoothing, n_classes, tile_c, grid_c, need_col_mask):
    confidence = 1.0 - smoothing
    inv_c = 1.0 / n_classes                          # folded at trace time
    k = pl.program_id(1)                             # class-tile index (reduction axis)
    last = grid_c - 1

    @pl.when(k == 0)
    def _init():
        m_ref[...] = jnp.full_like(m_ref, -jnp.inf)
        s_ref[...] = jnp.zeros_like(s_ref)
        sx_ref[...] = jnp.zeros_like(sx_ref)

    x = x_ref[...].astype(jnp.float32)               # (TN, TC), upcast in-register

    def _accumulate(x_for_max, x_for_sum):
        # ---- online log-sum-exp carry ----------------------------------------
        tile_max = jnp.max(x_for_max, axis=-1, keepdims=True)        # (TN, 1)
        m_new = jnp.maximum(m_ref[...], tile_max)
        alpha = jnp.exp(m_ref[...] - m_new)                          # exp(-inf)=0 on tile 0
        # Cheap (TN,1) guard: rows whose running max is still -inf (all -inf logits)
        # would otherwise produce exp(nan). Partial protection only; normal inputs fine.
        alpha = jnp.where(m_new == -jnp.inf, 0.0, alpha)
        s_ref[...] = alpha * s_ref[...] + jnp.sum(jnp.exp(x_for_max - m_new),
                                                  axis=-1, keepdims=True)
        m_ref[...] = m_new
        # ---- running sum of logits (smoothing term uses mean(x) = sx / C) ----
        sx_ref[...] += jnp.sum(x_for_sum, axis=-1, keepdims=True)

    if need_col_mask:                                 # static Python bool
        # Only the last class tile is partial: keep the mask (1 cmp + 2 selects per
        # element) off the hot path for the first grid_c-1 tiles.
        @pl.when(k < last)
        def _full_tile():
            _accumulate(x, x)

        @pl.when(k == last)
        def _partial_tile():
            lane = jax.lax.broadcasted_iota(jnp.int32, x.shape, 1)
            valid = lane < (n_classes - last * tile_c)   # relative bound, no global col id
            _accumulate(jnp.where(valid, x, -jnp.inf),   # padded lanes never win the max
                        jnp.where(valid, x, 0.0))        # padded lanes don't bias sum(x)
    else:
        _accumulate(x, x)

    # ---- finalize per-row loss on the last class tile -----------------------------
    @pl.when(k == last)
    def _finalize():
        lse = m_ref[...] + jnp.log(s_ref[...])           # (TN, 1)
        nll = lse - xt_ref[...]                          # x[target] pre-gathered wrapper-side
        smooth = lse - sx_ref[...] * inv_c
        loss_ref[...] = (confidence * nll + smoothing * smooth).astype(loss_ref.dtype)


def _default_tiling():
    """Per-generation tile/VMEM defaults. Conservative fallback fits every chip."""
    kind = ""
    try:
        kind = jax.devices()[0].device_kind.lower()
    except Exception:
        pass
    if ("v5" in kind) or ("v6" in kind):
        # 128 MiB physical VMEM: 8 MiB/buffer, 16 MiB double-buffered logits stream.
        return 512, 4096, 48 * 1024 * 1024
    # v7x (64 MiB physical per TC) and unknown chips: 4 MiB/buffer, 32 MiB scoped limit.
    return 256, 4096, 32 * 1024 * 1024


def label_smoothing_cross_entropy(x: jax.Array, target: jax.Array,
                                  smoothing: float = 0.1, *,
                                  tile_n: int | None = None,
                                  tile_c: int | None = None,
                                  vmem_limit_bytes: int | None = None) -> jax.Array:
    """x: (N, C) logits (f32 or bf16), target: (N,) int class indices. Scalar f32 loss."""
    assert 0.0 <= smoothing < 1.0
    n, c = x.shape
    d_tn, d_tc, d_vmem = _default_tiling()
    tile_n = d_tn if tile_n is None else tile_n
    tile_c = d_tc if tile_c is None else tile_c
    vmem_limit_bytes = d_vmem if vmem_limit_bytes is None else vmem_limit_bytes

    # Row tile: keep grid_r >= 2 when possible so the "parallel" row axis actually
    # shards across v7x's two TensorCores (harmless on single-TC v5e/v6e).
    if n <= tile_n:
        half = -(-n // 2)                    # ceil(n/2)
        tn = min(n, -(-half // 8) * 8)       # round up to sublane multiple, cap at n
    else:
        tn = tile_n
    # Class tile: full dim if small, otherwise a multiple of 128.
    if c <= tile_c:
        tc = c
    else:
        assert tile_c % 128 == 0
        tc = tile_c

    grid_r = pl.cdiv(n, tn)
    grid_c = pl.cdiv(c, tc)
    need_col_mask = (c % tc) != 0

    # Wrapper-side gather of x[target]: N extra cachelines of HBM traffic (<<1% of the
    # N*C logits stream) in exchange for deleting the in-kernel one-hot gather chain.
    xt = jnp.take_along_axis(x, target.astype(jnp.int32)[:, None], axis=1)
    xt = xt.astype(jnp.float32)

    kernel = functools.partial(
        _ls_ce_kernel,
        smoothing=float(smoothing), n_classes=c,
        tile_c=tc, grid_c=grid_c, need_col_mask=need_col_mask)

    per_row = pl.pallas_call(
        kernel,
        out_shape=jax.ShapeDtypeStruct((n, 1), jnp.float32),
        grid_spec=pltpu.PrefetchScalarGridSpec(
            num_scalar_prefetch=0,
            grid=(grid_r, grid_c),
            in_specs=[
                pl.BlockSpec((tn, tc), lambda i, k: (i, k)),   # streaming logits tile
                pl.BlockSpec((tn, 1), lambda i, k: (i, 0)),    # pre-gathered x[target]
            ],
            # (N,1) output kept deliberately: bytes are tiny, and the masked boundary
            # store is what keeps partial row tiles correct.
            out_specs=pl.BlockSpec((tn, 1), lambda i, k: (i, 0)),
            scratch_shapes=[pltpu.VMEM((tn, 1), jnp.float32)] * 3,   # m, sum-exp, sum-x
        ),
        compiler_params=pltpu.CompilerParams(
            dimension_semantics=("parallel", "arbitrary"),
            vmem_limit_bytes=vmem_limit_bytes,
        ),
    )(x, xt)

    # Final mean over N rows: trivial wrapper-side reduction (N*4 bytes).
    return jnp.mean(per_row)


def _reference(x, target, smoothing=0.1):
    logprobs = jax.nn.log_softmax(x.astype(jnp.float32), axis=-1)
    nll = -jnp.take_along_axis(logprobs, target[:, None], axis=-1)[:, 0]
    smooth = -jnp.mean(logprobs, axis=-1)
    loss = (1.0 - smoothing) * nll + smoothing * smooth
    return jnp.mean(loss)


if __name__ == "__main__":
    key = jax.random.PRNGKey(0)
    kx, kt, kx2, kt2 = jax.random.split(key, 4)

    # Small shape consistent with the module: a batch of logits over C classes.
    N, C = 8, 32
    x = jax.random.normal(kx, (N, C), dtype=jnp.float32)
    target = jax.random.randint(kt, (N,), 0, C, dtype=jnp.int32)

    loss = jax.block_until_ready(label_smoothing_cross_entropy(x, target, smoothing=0.1))
    ref = _reference(x, target, smoothing=0.1)
    assert jnp.allclose(loss, ref, atol=1e-4, rtol=1e-5), (loss, ref)

    # Exercise multi-tile paths with tiny data: partial row tile (20 % 8 != 0) and a
    # masked partial class tile (640 % 256 != 0), gated to the last class step.
    N2, C2 = 20, 640
    x2 = jax.random.normal(kx2, (N2, C2), dtype=jnp.float32)
    target2 = jax.random.randint(kt2, (N2,), 0, C2, dtype=jnp.int32)

    loss2 = jax.block_until_ready(
        label_smoothing_cross_entropy(x2, target2, smoothing=0.1, tile_n=8, tile_c=256))
    ref2 = _reference(x2, target2, smoothing=0.1)
    assert jnp.allclose(loss2, ref2, atol=1e-4, rtol=1e-5), (loss2, ref2)

    print("KERNEL_OK")
</pallas_src>

<mosaic_0001>
module attributes {stable_mosaic.version = 11 : i64} {
  func.func @_ls_ce_kernel(%arg0: i32, %arg1: i32, %arg2: memref<8x32xf32, #tpu.memory_space<vmem>>, %arg3: memref<8x1xf32, #tpu.memory_space<vmem>>, %arg4: memref<8x1xf32, #tpu.memory_space<vmem>>, %arg5: memref<8x1xf32, #tpu.memory_space<vmem>>, %arg6: memref<8x1xf32, #tpu.memory_space<vmem>>, %arg7: memref<8x1xf32, #tpu.memory_space<vmem>>) attributes {dimension_semantics = [#tpu.dimension_semantics<parallel>, #tpu.dimension_semantics<arbitrary>], iteration_bounds = array<i64: 1, 1>, scalar_prefetch = 0 : i64, scratch_operands = 3 : i64, tpu.core_type = #tpu.core_type<tc>, window_params = [{transform_indices = @transform_0, window_bounds = array<i64: 8, 32>}, {transform_indices = @transform_1, window_bounds = array<i64: 8, 1>}, {transform_indices = @transform_2, window_bounds = array<i64: 8, 1>}]} {
    %c0_i32 = arith.constant 0 : i32
    %0 = arith.cmpi eq, %arg1, %c0_i32 : i32
    %1 = arith.extui %0 : i1 to i32
    %c0_i32_0 = arith.constant 0 : i32
    %2 = arith.cmpi ne, %1, %c0_i32_0 : i32
    scf.if %2 {
      %cst_22 = arith.constant 0xFF800000 : f32
      %33 = vector.broadcast %cst_22 : f32 to vector<8x1xf32>
      %c0_23 = arith.constant 0 : index
      %c0_24 = arith.constant 0 : index
      %34 = vector.load %arg5[%c0_23, %c0_24] : memref<8x1xf32, #tpu.memory_space<vmem>>, vector<8x1xf32>
      tpu.vector_store %arg5[%c0_23, %c0_24], %33 {strides = array<i32>} : memref<8x1xf32, #tpu.memory_space<vmem>>, vector<8x1xf32>,
      %cst_25 = arith.constant 0.000000e+00 : f32
      %35 = vector.broadcast %cst_25 : f32 to vector<8x1xf32>
      %c0_26 = arith.constant 0 : index
      %c0_27 = arith.constant 0 : index
      %36 = vector.load %arg6[%c0_26, %c0_27] : memref<8x1xf32, #tpu.memory_space<vmem>>, vector<8x1xf32>
      tpu.vector_store %arg6[%c0_26, %c0_27], %35 {strides = array<i32>} : memref<8x1xf32, #tpu.memory_space<vmem>>, vector<8x1xf32>,
      %cst_28 = arith.constant 0.000000e+00 : f32
      %37 = vector.broadcast %cst_28 : f32 to vector<8x1xf32>
      %c0_29 = arith.constant 0 : index
      %c0_30 = arith.constant 0 : index
      %38 = vector.load %arg7[%c0_29, %c0_30] : memref<8x1xf32, #tpu.memory_space<vmem>>, vector<8x1xf32>
      tpu.vector_store %arg7[%c0_29, %c0_30], %37 {strides = array<i32>} : memref<8x1xf32, #tpu.memory_space<vmem>>, vector<8x1xf32>,
    } else {
    }
    %c0 = arith.constant 0 : index
    %c0_1 = arith.constant 0 : index
    %3 = vector.load %arg2[%c0, %c0_1] : memref<8x32xf32, #tpu.memory_space<vmem>>, vector<8x32xf32>
    %cst = arith.constant dense<0xFF800000> : vector<8xf32>
    %4 = vector.multi_reduction <maximumf>, %3, %cst [1] : vector<8x32xf32> to vector<8xf32>
    %5 = vector.shape_cast %4 : vector<8xf32> to vector<8x1xf32>
    %c0_2 = arith.constant 0 : index
    %c0_3 = arith.constant 0 : index
    %6 = vector.load %arg5[%c0_2, %c0_3] : memref<8x1xf32, #tpu.memory_space<vmem>>, vector<8x1xf32>
    %7 = arith.maximumf %6, %5 : vector<8x1xf32>
    %c0_4 = arith.constant 0 : index
    %c0_5 = arith.constant 0 : index
    %8 = vector.load %arg5[%c0_4, %c0_5] : memref<8x1xf32, #tpu.memory_space<vmem>>, vector<8x1xf32>
    %9 = arith.subf %8, %7 : vector<8x1xf32>
    %10 = math.exp %9 : vector<8x1xf32>
    %cst_6 = arith.constant 0xFF800000 : f32
    %11 = vector.broadcast %cst_6 : f32 to vector<8x1xf32>
    %12 = arith.cmpf oeq, %7, %11 : vector<8x1xf32>
    %cst_7 = arith.constant 0.000000e+00 : f32
    %13 = vector.broadcast %cst_7 : f32 to vector<8x1xf32>
    %14 = arith.select %12, %13, %10 : vector<8x1xi1>, vector<8x1xf32>
    %c0_8 = arith.constant 0 : index
    %c0_9 = arith.constant 0 : index
    %15 = vector.load %arg6[%c0_8, %c0_9] : memref<8x1xf32, #tpu.memory_space<vmem>>, vector<8x1xf32>
    %16 = arith.mulf %14, %15 : vector<8x1xf32>
    %17 = vector.broadcast %7 : vector<8x1xf32> to vector<8x32xf32>
    %18 = arith.subf %3, %17 : vector<8x32xf32>
    %19 = math.exp %18 : vector<8x32xf32>
    %cst_10 = arith.constant dense<0.000000e+00> : vector<8xf32>
    %20 = vector.multi_reduction <add>, %19, %cst_10 [1] : vector<8x32xf32> to vector<8xf32>
    %21 = vector.shape_cast %20 : vector<8xf32> to vector<8x1xf32>
    %22 = arith.addf %16, %21 : vector<8x1xf32>
    %c0_11 = arith.constant 0 : index
    %c0_12 = arith.constant 0 : index
    %23 = vector.load %arg6[%c0_11, %c0_12] : memref<8x1xf32, #tpu.memory_space<vmem>>, vector<8x1xf32>
    tpu.vector_store %arg6[%c0_11, %c0_12], %22 {strides = array<i32>} : memref<8x1xf32, #tpu.memory_space<vmem>>, vector<8x1xf32>,
    %c0_13 = arith.constant 0 : index
    %c0_14 = arith.constant 0 : index
    %24 = vector.load %arg5[%c0_13, %c0_14] : memref<8x1xf32, #tpu.memory_space<vmem>>, vector<8x1xf32>
    tpu.vector_store %arg5[%c0_13, %c0_14], %7 {strides = array<i32>} : memref<8x1xf32, #tpu.memory_space<vmem>>, vector<8x1xf32>,
    %c0_15 = arith.constant 0 : index
    %c0_16 = arith.constant 0 : index
    %25 = vector.load %arg7[%c0_15, %c0_16] : memref<8x1xf32, #tpu.memory_space<vmem>>, vector<8x1xf32>
    %cst_17 = arith.constant dense<0.000000e+00> : vector<8xf32>
    %26 = vector.multi_reduction <add>, %3, %cst_17 [1] : vector<8x32xf32> to vector<8xf32>
    %27 = vector.shape_cast %26 : vector<8xf32> to vector<8x1xf32>
    %28 = arith.addf %25, %27 : vector<8x1xf32>
    %c0_18 = arith.constant 0 : index
    %c0_19 = arith.constant 0 : index
    %29 = vector.load %arg7[%c0_18, %c0_19] : memref<8x1xf32, #tpu.memory_space<vmem>>, vector<8x1xf32>
    tpu.vector_store %arg7[%c0_18, %c0_19], %28 {strides = array<i32>} : memref<8x1xf32, #tpu.memory_space<vmem>>, vector<8x1xf32>,
    %c0_i32_20 = arith.constant 0 : i32
    %30 = arith.cmpi eq, %arg1, %c0_i32_20 : i32
    %31 = arith.extui %30 : i1 to i32
    %c0_i32_21 = arith.constant 0 : i32
    %32 = arith.cmpi ne, %31, %c0_i32_21 : i32
    scf.if %32 {
      %c0_22 = arith.constant 0 : index
      %c0_23 = arith.constant 0 : index
      %33 = vector.load %arg5[%c0_22, %c0_23] : memref<8x1xf32, #tpu.memory_space<vmem>>, vector<8x1xf32>
      %c0_24 = arith.constant 0 : index
      %c0_25 = arith.constant 0 : index
      %34 = vector.load %arg6[%c0_24, %c0_25] : memref<8x1xf32, #tpu.memory_space<vmem>>, vector<8x1xf32>
      %35 = math.log %34 : vector<8x1xf32>
      %36 = arith.addf %33, %35 : vector<8x1xf32>
      %c0_26 = arith.constant 0 : index
      %c0_27 = arith.constant 0 : index
      %37 = vector.load %arg3[%c0_26, %c0_27] : memref<8x1xf32, #tpu.memory_space<vmem>>, vector<8x1xf32>
      %38 = arith.subf %36, %37 : vector<8x1xf32>
      %c0_28 = arith.constant 0 : index
      %c0_29 = arith.constant 0 : index
      %39 = vector.load %arg7[%c0_28, %c0_29] : memref<8x1xf32, #tpu.memory_space<vmem>>, vector<8x1xf32>
      %cst_30 = arith.constant 3.125000e-02 : f32
      %40 = vector.broadcast %cst_30 : f32 to vector<8x1xf32>
      %41 = arith.mulf %39, %40 : vector<8x1xf32>
      %42 = arith.subf %36, %41 : vector<8x1xf32>
      %cst_31 = arith.constant 0.899999976 : f32
      %43 = vector.broadcast %cst_31 : f32 to vector<8x1xf32>
      %44 = arith.mulf %43, %38 : vector<8x1xf32>
      %cst_32 = arith.constant 1.000000e-01 : f32
      %45 = vector.broadcast %cst_32 : f32 to vector<8x1xf32>
      %46 = arith.mulf %45, %42 : vector<8x1xf32>
      %47 = arith.addf %44, %46 : vector<8x1xf32>
      %c0_33 = arith.constant 0 : index
      %c0_34 = arith.constant 0 : index
      %48 = vector.load %arg4[%c0_33, %c0_34] : memref<8x1xf32, #tpu.memory_space<vmem>>, vector<8x1xf32>
      tpu.vector_store %arg4[%c0_33, %c0_34], %47 {strides = array<i32>} : memref<8x1xf32, #tpu.memory_space<vmem>>, vector<8x1xf32>,
    } else {
    }
    return
  }
  func.func @transform_0(%arg0: i32, %arg1: i32) -> (i32, i32) {
    %c0_i32 = arith.constant 0 : i32
    return %arg0, %arg1 : i32, i32
  }
  func.func @transform_1(%arg0: i32, %arg1: i32) -> (i32, i32) {
    %c0_i32 = arith.constant 0 : i32
    %c0_i32_0 = arith.constant 0 : i32
    return %arg0, %c0_i32 : i32, i32
  }
  func.func @transform_2(%arg0: i32, %arg1: i32) -> (i32, i32) {
    %c0_i32 = arith.constant 0 : i32
    %c0_i32_0 = arith.constant 0 : i32
    return %arg0, %c0_i32 : i32, i32
  }
}

</mosaic_0001>

<bundles_post_ra>
// kernel: tpu_custom_call.1
= control target key start
LH: loop header
LB: loop body
LE: loop exit
PB: predicated region body
PF: predicated region fallthrough
CT: control target
= control target key end

     0   :  { %vm20_vm0 = vcmask 261120   ;;  %vm15_vm1 = vcmask 7168   ;;  %v85_v1 = vmov -inf   ;;  %v86_v3 = vmov 0   ;;  %s122_s0 = inlined_call_operand.vmem [shape: f32[8,32], index: 0, kind: input, shape index: {}]   ;;  %s123_s1 = inlined_call_operand.vmem [shape: f32[8,1], index: 1, kind: input, shape index: {}]   ;;  %s124_s2 = inlined_call_operand.vmem [shape: f32[8,1], index: 2, kind: output, shape index: {}]  }
   0x1   :  { %v19_v0 = vld [vmem:[%s122_s0] sm:$0xff]  ;;  %16 = vst.msk [vmem:[#allocation2] sm:$0xff] %vm15_vm1, %v85_v1  ;;  %78 = vset.pattern.permute.xlu0 %v86_v3  ;;  %v87_v4 = vmov 0.0  }
   0x2   :  { %v21_v2 = vsel %vm20_vm0, %v19_v0, -inf  ;;  %17 = vst.msk [vmem:[#allocation3] sm:$0xff] %vm15_vm1, %v87_v4  ;;  %18 = vst.msk [vmem:[#allocation4] sm:$0xff] %vm15_vm1, %v87_v4  ;;  %v49_v17 = vsel %vm20_vm0, %v19_v0, 0.0  ;;  %v62_v31 = vld [vmem:[%s123_s1] sm:$0xff] }
   0x3   :  { %22 = vmax.xlane.f32.xlu0 %v21_v2 }
   0x8   :  { %v24_v5 = vld [vmem:[#allocation2] sm:$0xff] }
   0x9   :  { %v31_v18 = vld [vmem:[#allocation3] sm:$0xff]  ;;  %v48_v22 = vld [vmem:[#allocation4] sm:$0xff] }
  0x90   :  { %v23_v6 = vpop.xlane.xlu0 %22 }
  0x91   :  { %v25_v7 = vmax.f32 %v24_v5, %v23_v6 }
  0x93   :  { %v26_v8 = vsub.f32 %v24_v5, %v25_v7  ;;  %47 = vst.msk [vmem:[#allocation2] sm:$0xff] %vm15_vm1, %v25_v7  ;;  %35 = vperm.xlu0 %78, %v25_v7   ;;  %vm29_vm2 = vcmp.eq.f32.partialorder %v25_v7, -inf }
  0x95   :  { %v27_v9 = vmul.f32 1.442695, %v26_v8 }
  0x97   :  { %79 = vpow2.f32 %v27_v9 }
  0x9a   :  { %v57_v30 = vld [vmem:[#allocation2] sm:$0xff] }
  0xa1   :  { %v80_v10 = vpop.eup %79 }
  0xa2   :  { %v30_v11 = vsel %vm29_vm2, 0.0, %v80_v10 }
  0xa3   :  { %v32_v19 = vmul.f32 %v31_v18, %v30_v11 }
 0x112   :  { %v36_v12 = vpop.permute.xlu0 %35 }
 0x113   :  { %v38_v13 = vsub.f32 %v19_v0, %v36_v12 }
 0x115   :  { %v39_v14 = vmul.f32 1.442695, %v38_v13 }
 0x117   :  { %81 = vpow2.f32 %v39_v14 }
 0x121   :  { %v82_v15 = vpop.eup %81 }
 0x122   :  { %v41_v16 = vsel %vm20_vm0, %v82_v15, 0.0 }
 0x123   :  { %42 = vadd.xlane.f32.xlu1 %v41_v16 }
 0x127   :  { %50 = vadd.xlane.f32.xlu1 %v49_v17 }
 0x1b0   :  { %v43_v20 = vpop.xlane.xlu1 %42 }
 0x1b1   :  { %v44_v21 = vadd.f32 %v43_v20, %v32_v19 }
 0x1b3   :  { %46 = vst.msk [vmem:[#allocation3] sm:$0xff] %vm15_vm1, %v44_v21 }
 0x1b4   :  { %v51_v23 = vpop.xlane.xlu1 %50 }
 0x1b5   :  { %v52_v24 = vadd.f32 %v51_v23, %v48_v22 }
 0x1b7   :  { %53 = vst.msk [vmem:[#allocation4] sm:$0xff] %vm15_vm1, %v52_v24 }
 0x1ba   :  { %v58_v25 = vld [vmem:[#allocation3] sm:$0xff] }
 0x1bb   :  { %83 = vlog2.f32 %v58_v25 }
 0x1be   :  { %v64_v26 = vld [vmem:[#allocation4] sm:$0xff] }
 0x1bf   :  { %v65_v29 = vmul.f32 0.03125, %v64_v26 }
 0x1c5   :  { %v84_v27 = vpop.eup %83 }
 0x1c6   :  { %v60_v28 = vmul.f32 0.6931472, %v84_v27 }
 0x1c8   :  { %v61_v32 = vadd.f32 %v60_v28, %v57_v30 }
 0x1ca   :  { %v63_v33 = vsub.f32 %v61_v32, %v62_v31  ;;  %v66_v34 = vsub.f32 %v61_v32, %v65_v29 }
 0x1cc   :  { %v67_v35 = vmul.f32 0.9, %v63_v33  ;;  %v68_v36 = vmul.f32 0.1, %v66_v34 }
 0x1ce   :  { %v69_v37 = vadd.f32 %v68_v36, %v67_v35 }
 0x1d0   :  { %70 = vst.msk [vmem:[%s124_s2] sm:$0xff] %vm15_vm1, %v69_v37 }

</bundles_post_ra>
